<compile_context>
chip_gen: v7x
topology: tpu7x:2x2x1
jax: 0.10.0
libtpu: 0.0.40
codegen_flags: <defaults>
</compile_context>

<pallas_src>
import jax
import jax.numpy as jnp
from jax.experimental import pallas as pl
from jax.experimental.pallas import tpu as pltpu


def _downsample_kernel(x2_ref, w01_ref, w2z_ref, b_ref, o_ref):
    """One grid step = one batch element.

    x2_ref  : [1, L_out+1, 2C]  zero-padded input packed as row pairs
    w01_ref : [2C, C]           conv taps 0 and 1 stacked along K
    w2z_ref : [2C, C]           conv tap 2 (bottom C rows are zero)
    b_ref   : [1, C]
    o_ref   : [1, L_out, C]
    """
    n_out = o_ref.shape[1]
    x2 = x2_ref[0]                       # [L_out+1, 2C], single load
    lo = x2[:n_out, :]                   # pairs (xp[2j],   xp[2j+1])
    hi = x2[1:n_out + 1, :]              # pairs (xp[2j+2], xp[2j+3])
    out = (jnp.dot(lo, w01_ref[...], preferred_element_type=jnp.float32)
           + jnp.dot(hi, w2z_ref[...], preferred_element_type=jnp.float32)
           + b_ref[...])                 # bias added once, after the matmuls
    o_ref[0] = out.astype(o_ref.dtype)


@jax.jit
def downsample_pallas(x, t, params):
    """x: [B, C, L] (PyTorch NCL), t ignored -> [B, C, L_out]."""
    del t                                # Downsample.forward ignores t
    B, C, L = x.shape
    l_out = (L - 1) // 2 + 1             # PyTorch Conv1d(k=3, s=2, p=1) output length
    lp = 2 * l_out + 2                   # padded length (always even)

    # glue: NCL -> NLC, zero-pad, fold consecutive rows into pairs of 2C lanes
    x_lc = jnp.transpose(x, (0, 2, 1))                        # [B, L, C]
    xp = jnp.pad(x_lc, ((0, 0), (1, lp - 1 - L), (0, 0)))     # [B, lp, C]
    x2 = xp.reshape(B, l_out + 1, 2 * C)                      # [B, L_out+1, 2C]

    # weight re-packing (PyTorch layout w: [C_out, C_in, 3])
    w = params["w"]
    w0 = w[:, :, 0].T                                         # [C, C]
    w1 = w[:, :, 1].T
    w2 = w[:, :, 2].T
    w01 = jnp.concatenate([w0, w1], axis=0)                   # [2C, C]
    w2z = jnp.concatenate([w2, jnp.zeros_like(w2)], axis=0)   # [2C, C]
    b = params["b"][None, :]                                  # [1, C]

    out_lc = pl.pallas_call(
        _downsample_kernel,
        out_shape=jax.ShapeDtypeStruct((B, l_out, C), jnp.float32),
        grid_spec=pltpu.PrefetchScalarGridSpec(
            num_scalar_prefetch=0,
            grid=(B,),
            in_specs=[
                pl.BlockSpec((1, l_out + 1, 2 * C), lambda bi: (bi, 0, 0)),  # x2
                pl.BlockSpec((2 * C, C), lambda bi: (0, 0)),                 # w01
                pl.BlockSpec((2 * C, C), lambda bi: (0, 0)),                 # w2z
                pl.BlockSpec((1, C), lambda bi: (0, 0)),                     # bias
            ],
            out_specs=pl.BlockSpec((1, l_out, C), lambda bi: (bi, 0, 0)),
        ),
        compiler_params=pltpu.CompilerParams(
            dimension_semantics=("parallel",)),
    )(x2, w01, w2z, b)

    return jnp.transpose(out_lc, (0, 2, 1))                   # back to [B, C, L_out]


def downsample_ref(x, t, params):
    """Pure-JAX reference mirroring the PyTorch forward."""
    del t
    dn = ("NCH", "OIH", "NCH")
    y = jax.lax.conv_general_dilated(x, params["w"], window_strides=(2,),
                                     padding=[(1, 1)], dimension_numbers=dn)
    return y + params["b"][None, :, None]


def init_params(key, n_channels):
    ks = jax.random.split(key, 2)
    s = 0.1
    return {
        "w": s * jax.random.normal(ks[0], (n_channels, n_channels, 3), jnp.float32),
        "b": s * jax.random.normal(ks[1], (n_channels,), jnp.float32),
    }


if __name__ == "__main__":
    B, C, L, Tc = 2, 4, 16, 32

    key = jax.random.PRNGKey(0)
    kx, kt, kp = jax.random.split(key, 3)
    x = jax.random.normal(kx, (B, C, L), jnp.float32)   # [batch, n_channels, seq_len]
    t = jax.random.normal(kt, (B, Tc), jnp.float32)     # unused by Downsample
    params = init_params(kp, C)

    out = downsample_pallas(x, t, params)
    out = jax.block_until_ready(out)

    ref = downsample_ref(x, t, params)
    assert out.shape == (B, C, (L - 1) // 2 + 1), out.shape
    assert jnp.allclose(out, ref, atol=1e-5, rtol=1e-5), float(jnp.max(jnp.abs(out - ref)))

    print("KERNEL_OK")
</pallas_src>

<mosaic_0001>
module attributes {stable_mosaic.version = 11 : i64} {
  func.func @_downsample_kernel(%arg0: i32, %arg1: memref<1x9x8xf32, #tpu.memory_space<vmem>>, %arg2: memref<8x4xf32, #tpu.memory_space<vmem>>, %arg3: memref<8x4xf32, #tpu.memory_space<vmem>>, %arg4: memref<1x4xf32, #tpu.memory_space<vmem>>, %arg5: memref<1x8x4xf32, #tpu.memory_space<vmem>>) attributes {dimension_semantics = [#tpu.dimension_semantics<parallel>], iteration_bounds = array<i64: 2>, scalar_prefetch = 0 : i64, scratch_operands = 0 : i64, tpu.core_type = #tpu.core_type<tc>, window_params = [{transform_indices = @transform_0, window_bounds = array<i64: 1, 9, 8>}, {pipeline_mode = #tpu.pipeline_mode<synchronous>, transform_indices = @transform_1, window_bounds = array<i64: 8, 4>}, {pipeline_mode = #tpu.pipeline_mode<synchronous>, transform_indices = @transform_2, window_bounds = array<i64: 8, 4>}, {pipeline_mode = #tpu.pipeline_mode<synchronous>, transform_indices = @transform_3, window_bounds = array<i64: 1, 4>}, {transform_indices = @transform_4, window_bounds = array<i64: 1, 8, 4>}]} {
    %c0 = arith.constant 0 : index
    %c0_0 = arith.constant 0 : index
    %c0_1 = arith.constant 0 : index
    %0 = vector.load %arg1[%c0, %c0_0, %c0_1] : memref<1x9x8xf32, #tpu.memory_space<vmem>>, vector<1x9x8xf32>
    %1 = vector.shape_cast %0 : vector<1x9x8xf32> to vector<9x8xf32>
    %2 = vector.extract_strided_slice %1 {offsets = [0, 0], sizes = [8, 8], strides = [1, 1]} : vector<9x8xf32> to vector<8x8xf32>
    %3 = vector.extract_strided_slice %1 {offsets = [1, 0], sizes = [8, 8], strides = [1, 1]} : vector<9x8xf32> to vector<8x8xf32>
    %c0_2 = arith.constant 0 : index
    %c0_3 = arith.constant 0 : index
    %4 = vector.load %arg2[%c0_2, %c0_3] : memref<8x4xf32, #tpu.memory_space<vmem>>, vector<8x4xf32>
    %cst = arith.constant dense<0.000000e+00> : vector<8x4xf32>
    %5 = tpu.matmul %2, %4, %cst {dimension_numbers = #tpu.dot_dimension_numbers<[1], [0], [0], [1], [0, 0, 1, 1], [], []>} : vector<8x8xf32>, vector<8x4xf32>, vector<8x4xf32> -> vector<8x4xf32>
    %c0_4 = arith.constant 0 : index
    %c0_5 = arith.constant 0 : index
    %6 = vector.load %arg3[%c0_4, %c0_5] : memref<8x4xf32, #tpu.memory_space<vmem>>, vector<8x4xf32>
    %cst_6 = arith.constant dense<0.000000e+00> : vector<8x4xf32>
    %7 = tpu.matmul %3, %6, %cst_6 {dimension_numbers = #tpu.dot_dimension_numbers<[1], [0], [0], [1], [0, 0, 1, 1], [], []>} : vector<8x8xf32>, vector<8x4xf32>, vector<8x4xf32> -> vector<8x4xf32>
    %8 = arith.addf %5, %7 : vector<8x4xf32>
    %c0_7 = arith.constant 0 : index
    %c0_8 = arith.constant 0 : index
    %9 = vector.load %arg4[%c0_7, %c0_8] : memref<1x4xf32, #tpu.memory_space<vmem>>, vector<1x4xf32>
    %10 = vector.broadcast %9 : vector<1x4xf32> to vector<8x4xf32>
    %11 = arith.addf %8, %10 : vector<8x4xf32>
    %c0_9 = arith.constant 0 : index
    %c0_10 = arith.constant 0 : index
    %c0_11 = arith.constant 0 : index
    %12 = vector.load %arg5[%c0_9, %c0_10, %c0_11] : memref<1x8x4xf32, #tpu.memory_space<vmem>>, vector<1x8x4xf32>
    %13 = vector.shape_cast %12 : vector<1x8x4xf32> to vector<8x4xf32>
    %14 = vector.shape_cast %11 : vector<8x4xf32> to vector<1x8x4xf32>
    tpu.vector_store %arg5[%c0_9, %c0_10, %c0_11], %14 {strides = array<i32>} : memref<1x8x4xf32, #tpu.memory_space<vmem>>, vector<1x8x4xf32>,
    return
  }
  func.func @transform_0(%arg0: i32) -> (i32, i32, i32) {
    %c0_i32 = arith.constant 0 : i32
    %c0_i32_0 = arith.constant 0 : i32
    %c0_i32_1 = arith.constant 0 : i32
    return %arg0, %c0_i32, %c0_i32_0 : i32, i32, i32
  }
  func.func @transform_1(%arg0: i32) -> (i32, i32) {
    %c0_i32 = arith.constant 0 : i32
    %c0_i32_0 = arith.constant 0 : i32
    %c0_i32_1 = arith.constant 0 : i32
    return %c0_i32, %c0_i32_0 : i32, i32
  }
  func.func @transform_2(%arg0: i32) -> (i32, i32) {
    %c0_i32 = arith.constant 0 : i32
    %c0_i32_0 = arith.constant 0 : i32
    %c0_i32_1 = arith.constant 0 : i32
    return %c0_i32, %c0_i32_0 : i32, i32
  }
  func.func @transform_3(%arg0: i32) -> (i32, i32) {
    %c0_i32 = arith.constant 0 : i32
    %c0_i32_0 = arith.constant 0 : i32
    %c0_i32_1 = arith.constant 0 : i32
    return %c0_i32, %c0_i32_0 : i32, i32
  }
  func.func @transform_4(%arg0: i32) -> (i32, i32, i32) {
    %c0_i32 = arith.constant 0 : i32
    %c0_i32_0 = arith.constant 0 : i32
    %c0_i32_1 = arith.constant 0 : i32
    return %arg0, %c0_i32, %c0_i32_0 : i32, i32, i32
  }
}

</mosaic_0001>

<bundles_post_ra>
// kernel: downsample_pallas.1
= control target key start
LH: loop header
LB: loop body
LE: loop exit
PB: predicated region body
PF: predicated region fallthrough
CT: control target
= control target key end

     0   :  { %s487_s15 = smov 0   ;;  %s513_s0 = inlined_call_operand.vmem [shape: f32[2,9,8], index: 0, kind: input, shape index: {}]   ;;  %s514_s1 = inlined_call_operand.vmem [shape: f32[8,4], index: 1, kind: input, shape index: {}]   ;;  %s515_s2 = inlined_call_operand.vmem [shape: f32[8,4], index: 2, kind: input, shape index: {}]   ;;  %s516_s3 = inlined_call_operand.vmem [shape: f32[1,4], index: 3, kind: input, shape index: {}]   ;;  %s517_s4 = inlined_call_operand.vmem [shape: f32[2,8,4], index: 4, kind: output, shape index: {}]  }
   0x1 LB: > { %s414_s16 = sadd.s32 4294967295, %s458_s15   ;;  %p418_p0 = scmp.ge.s32.totalorder %s458_s15, 1  ;;  %s458_s15 = sphi %s487_s15, %s14_s15  }
   0x2   : > { %p162_p1 = scmp.lt.s32.totalorder %s458_s15, 3 }
   0x4   : > { %p163_p2 = pnand %p418_p0, %p162_p1 }
   0x5   : > { %v198_v0 = vld [vmem:[%s514_s1] sm:$0xff] (!%p163_p2)  ;;  %p187_p3 = scmp.lt.s32.totalorder (!%p163_p2), %s414_s16, 1  ;;  %v460_v2 = vmov (!%p163_p2), 0.0   ;;  %vm461_vm0 = vmmov (!%p163_p2), 0   ;;  %vm206_vm1 = vcmask (!%p163_p2), 64512   ;;  %vm202_vm2 = vcmask (!%p163_p2), 1046528  }
   0x6   : > { %166 = sbr.rel (%p163_p2) target bundleno = 237 (0xed), region = 36  ;;  %v199_v1 = vld [vmem:[%s515_s2] sm:$0xff] (!%p163_p2)  ;;  %437 = vmatprep.subr.mxu1 (!%p163_p2), %v460_v2  ;;  %432 = vmatprep.subr.mxu0 (!%p163_p2), %v460_v2  ;;  %vm359_vm3 = vcmask (!%p163_p2), 31744  }
   0x7   : > { %438 = vmatpush3.msra.mxu1 (!%p163_p2), %v198_v0  ;;  %439 = vmatprep.mubr.msk.f32.mxu1 (!%p163_p2), %vm461_vm0, %v460_v2  ;;  %v424_v11 = vld [vmem:[%s516_s3] ss:$0 sm:$0xff] (!%p163_p2) }
   0x8   : > { %433 = vmatpush3.msra.mxu0 (!%p163_p2), %v199_v1  ;;  %434 = vmatprep.mubr.msk.f32.mxu0 (!%p163_p2), %vm461_vm0, %v460_v2 }
   0xd   : > { %s519_s16 = smov (!%p187_p3, %s414_s16), 1 }
   0xe   : > { %s427_s21 = sshll.u32 %s519_s16, 4  ;;  %s421_s25 = sshll.u32 %s519_s16, 3 }
   0xf   : > { %s191_s24 = scalar_lea.vmem %s513_s0, %s427_s21  ;;  %s195_s30 = scalar_lea.vmem %s517_s4, %s421_s25 }
  0x10   : > { %v196_v3 = vld [vmem:[%s191_s24] sm:$0xff]  ;;  %v197_v4 = vld [vmem:[%s191_s24 + $0x8] sm:$0x1] }
  0x11   : > { %v203_v5 = vrot.slane %v196_v3, 1  ;;  %v204_v6 = vrot.slane %v197_v4, 1  ;;  %440 = vmatmul.mubr.msk.f32.vlgmr.msra.gmra.mrb[0].mxu1 %vm206_vm1, %v196_v3 }
  0x13   : > { %v205_v7 = vsel %vm202_vm2, %v203_v5, %v204_v6 }
  0x14   : > { %435 = vmatmul.mubr.msk.f32.vlgmr.msra.gmra.mrb[0].mxu0 %vm206_vm1, %v205_v7 }
  0xe4   : > { %v347_v8 = vpop.f32.mrb[0].mxu1 }
  0xe5   : > { %v441_v9 = vpop.f32.mrb[1].mxu1 }
  0xe7   : > { %v275_v10 = vpop.f32.mrb[0].mxu0 }
  0xe8   : > { %v348_v12 = vadd.f32 %v347_v8, %v275_v10  ;;  %v436_v13 = vpop.f32.mrb[1].mxu0 }
  0xea   : > { %v358_v14 = vadd.f32 %v424_v11, %v348_v12 }
  0xec   : > { %360 = vst.msk [vmem:[%s195_s30] sm:$0xff] %vm359_vm3, %v358_v14 }
  0xed PF: > { %s14_s15 = sadd.s32 1, %s458_s15  }
  0xee   : > { %p11_p4 = scmp.ge.s32.totalorder %s14_s15, 4  }
  0xf0   :  { %13 = sbr.rel (!%p11_p4) target bundleno = 1 (0x1), region = 66 }

</bundles_post_ra>
